<compile_context>
chip_gen: v5e
topology: v5e:2x2
jax: 0.10.0
libtpu: 0.0.40
codegen_flags: <defaults>
</compile_context>

<pallas_src>
import jax
import jax.numpy as jnp
import numpy as np
from jax.experimental import pallas as pl
from jax.experimental.pallas import tpu as pltpu


def _round_up(x, m):
    return ((x + m - 1) // m) * m


def self_attention_kernel(q_ref, v_ref, w1t_ref, b1_ref, vrow_ref, bv_ref,
                          ctx_ref, attn_ref, score_ref):
    # Block shapes for one grid step (TB batch elements):
    #   q_ref: (TB, S, Din)   v_ref: (TB, S, Dv)
    #   w1t_ref: (Din, Dout)  b1_ref: (1, Dout)  vrow_ref: (1, Dout)
    #   bv_ref: (1,) scalar in SMEM
    #   ctx_ref: (TB, Dv)     attn_ref / score_ref: (TB, S)
    tb, s, din = q_ref.shape
    dout = w1t_ref.shape[1]

    # --- W1(query) + tanh: one MXU matmul over the whole batch tile (M = TB*S rows).
    # f32 accumulation regardless of the streaming dtype of query; tanh runs on EUP.
    q2 = q_ref[...].reshape(tb * s, din)
    h = jnp.tanh(
        jnp.dot(q2, w1t_ref[...], preferred_element_type=jnp.float32) + b1_ref[...]
    )                                                              # (TB*S, Dout) f32

    # --- V(.) -> one scalar score per (batch, position): VPU multiply + lane reduce
    # instead of an (TB*S, Dout) x (Dout, 1) matmul that would use 1 MXU output column.
    h3 = h.reshape(tb, s, dout)
    score = jnp.sum(h3 * vrow_ref[...], axis=-1) + bv_ref[0]       # (TB, S) f32

    # --- Softmax over the sequence axis (PyTorch dim=1), numerically stabilized.
    m = jnp.max(score, axis=-1, keepdims=True)
    e = jnp.exp(score - m)                                         # EUP
    # Exact division keeps the 1e-5 reference tolerance; pl.reciprocal(..., approx=True)
    # would offload the divide to the EUP at a small accuracy cost.
    attn = e / jnp.sum(e, axis=-1, keepdims=True)                  # (TB, S)

    # --- Weighted sum of values over the sequence axis (VPU mul + sublane/XLU reduce;
    # S is tiny here — a batched MXU matmul would waste the systolic array at M=1).
    vals = v_ref[...].astype(jnp.float32)                          # (TB, S, Dv)
    ctx = jnp.sum(attn[:, :, None] * vals, axis=1)                 # (TB, Dv)

    ctx_ref[...] = ctx
    attn_ref[...] = attn
    score_ref[...] = score


def self_attention(query, values, W1, b1, V, bV, *, tb=None):
    """query: (B,S,Din)  values: (B,S,Dv)  W1: (Dout,Din)  b1: (Dout,)  V: (1,Dout)  bV: (1,)

    Returns (context (B,Dv), attention_weights (B,S,1), score (B,S,1)), matching the
    PyTorch SelfAttention.forward outputs.
    """
    B, S, Din = query.shape
    Dv = values.shape[-1]
    Dout = W1.shape[0]

    if tb is None:
        # Target ~512 MXU rows (TB*S) per grid step, sublane-aligned (multiple of 8),
        # capped by the (padded) batch.
        tb = min(_round_up(B, 8), _round_up(max(1, 512 // max(S, 1)), 8))
        # Keep >= 2 grid steps when the batch allows, so both v7x TensorCores get work.
        if tb >= B and B > 8:
            tb = _round_up((B + 1) // 2, 8)
    tb = max(8, _round_up(tb, 8))
    B_pad = _round_up(B, tb)

    # Pad the batch with zeros (results for padded rows are discarded below).
    if B_pad != B:
        pad_width = ((0, B_pad - B), (0, 0), (0, 0))
        query = jnp.pad(query, pad_width)
        values = jnp.pad(values, pad_width)

    # Glue: pre-transpose W1, reshape biases; weights stay f32, inputs keep their dtype.
    w1t = W1.T.astype(jnp.float32)                   # (Din, Dout)
    b1_2d = b1.reshape(1, Dout).astype(jnp.float32)  # (1, Dout)
    vrow = V.reshape(1, Dout).astype(jnp.float32)    # (1, Dout) row for the lane reduce
    bv_1d = bV.reshape(1).astype(jnp.float32)        # (1,) scalar -> SMEM

    in_bytes = (query.size * query.dtype.itemsize
                + values.size * values.dtype.itemsize
                + (w1t.size + b1_2d.size + vrow.size + bv_1d.size) * 4)
    out_bytes = (B_pad * Dv + 2 * B_pad * S) * 4
    cost = pl.CostEstimate(
        flops=2 * B_pad * S * Din * Dout + 4 * B_pad * S * Dout + 3 * B_pad * S * Dv,
        transcendentals=B_pad * S * (Dout + 1),          # tanh + exp
        bytes_accessed=int(in_bytes + out_bytes),
    )

    grid = (B_pad // tb,)
    ctx_p, attn_p, score_p = pl.pallas_call(
        self_attention_kernel,
        out_shape=(
            jax.ShapeDtypeStruct((B_pad, Dv), jnp.float32),  # context
            jax.ShapeDtypeStruct((B_pad, S), jnp.float32),   # attention weights (lane-dense)
            jax.ShapeDtypeStruct((B_pad, S), jnp.float32),   # raw scores (lane-dense)
        ),
        grid=grid,
        in_specs=[
            pl.BlockSpec((tb, S, Din), lambda b: (b, 0, 0)),
            pl.BlockSpec((tb, S, Dv), lambda b: (b, 0, 0)),
            pl.BlockSpec((Din, Dout), lambda b: (0, 0)),     # resident weights
            pl.BlockSpec((1, Dout), lambda b: (0, 0)),
            pl.BlockSpec((1, Dout), lambda b: (0, 0)),
            pl.BlockSpec(memory_space=pltpu.MemorySpace.SMEM),   # bV scalar
        ],
        out_specs=(
            pl.BlockSpec((tb, Dv), lambda b: (b, 0)),
            pl.BlockSpec((tb, S), lambda b: (b, 0)),
            pl.BlockSpec((tb, S), lambda b: (b, 0)),
        ),
        compiler_params=pltpu.CompilerParams(dimension_semantics=("parallel",)),
        cost_estimate=cost,
    )(query, values, w1t, b1_2d, vrow, bv_1d)

    ctx = ctx_p[:B]
    attn = attn_p[:B].reshape(B, S, 1)
    score = score_p[:B].reshape(B, S, 1)
    return ctx, attn, score


def _reference(query, values, W1, b1, V, bV):
    h = jnp.tanh(jnp.einsum("bsd,od->bso", query, W1) + b1)
    score = jnp.einsum("bso,eo->bse", h, V) + bV
    attn = jax.nn.softmax(score, axis=1)
    ctx = jnp.sum(attn * values, axis=1)
    return ctx, attn, score


if __name__ == "__main__":
    B, S, IN_UNITS, OUT_UNITS, DV = 16, 8, 32, 32, 16

    key = jax.random.PRNGKey(0)
    kq, kv, kw1, kb1, kV, kbV = jax.random.split(key, 6)

    query = jax.random.normal(kq, (B, S, IN_UNITS), dtype=jnp.float32)
    values = jax.random.normal(kv, (B, S, DV), dtype=jnp.float32)

    # Deterministic parameter init mimicking nn.Linear (uniform +/- 1/sqrt(fan_in)).
    bnd1 = 1.0 / np.sqrt(IN_UNITS)
    W1 = jax.random.uniform(kw1, (OUT_UNITS, IN_UNITS), jnp.float32, -bnd1, bnd1)
    b1 = jax.random.uniform(kb1, (OUT_UNITS,), jnp.float32, -bnd1, bnd1)
    bnd2 = 1.0 / np.sqrt(OUT_UNITS)
    V = jax.random.uniform(kV, (1, OUT_UNITS), jnp.float32, -bnd2, bnd2)
    bV = jax.random.uniform(kbV, (1,), jnp.float32, -bnd2, bnd2)

    ctx, attn, score = self_attention(query, values, W1, b1, V, bV)
    jax.block_until_ready((ctx, attn, score))

    # Sanity check against a pure-JAX reference.
    ctx_r, attn_r, score_r = _reference(query, values, W1, b1, V, bV)
    np.testing.assert_allclose(np.asarray(ctx), np.asarray(ctx_r), rtol=1e-5, atol=1e-5)
    np.testing.assert_allclose(np.asarray(attn), np.asarray(attn_r), rtol=1e-5, atol=1e-5)
    np.testing.assert_allclose(np.asarray(score), np.asarray(score_r), rtol=1e-5, atol=1e-5)

    print("KERNEL_OK")
</pallas_src>

<mosaic_0001>
module attributes {stable_mosaic.version = 11 : i64} {
  func.func @self_attention_kernel(%arg0: i32, %arg1: memref<8x8x32xf32, #tpu.memory_space<vmem>>, %arg2: memref<8x8x16xf32, #tpu.memory_space<vmem>>, %arg3: memref<32x32xf32, #tpu.memory_space<vmem>>, %arg4: memref<1x32xf32, #tpu.memory_space<vmem>>, %arg5: memref<1x32xf32, #tpu.memory_space<vmem>>, %arg6: memref<1xf32, #tpu.memory_space<smem>>, %arg7: memref<8x16xf32, #tpu.memory_space<vmem>>, %arg8: memref<8x8xf32, #tpu.memory_space<vmem>>, %arg9: memref<8x8xf32, #tpu.memory_space<vmem>>) attributes {dimension_semantics = [#tpu.dimension_semantics<parallel>], iteration_bounds = array<i64: 2>, scalar_prefetch = 0 : i64, scratch_operands = 0 : i64, tpu.core_type = #tpu.core_type<tc>, window_params = [{transform_indices = @transform_0, window_bounds = array<i64: 8, 8, 32>}, {transform_indices = @transform_1, window_bounds = array<i64: 8, 8, 16>}, {pipeline_mode = #tpu.pipeline_mode<synchronous>, transform_indices = @transform_2, window_bounds = array<i64: 32, 32>}, {pipeline_mode = #tpu.pipeline_mode<synchronous>, transform_indices = @transform_3, window_bounds = array<i64: 1, 32>}, {pipeline_mode = #tpu.pipeline_mode<synchronous>, transform_indices = @transform_4, window_bounds = array<i64: 1, 32>}, {transform_indices = @transform_5, window_bounds = array<i64: 1>}, {transform_indices = @transform_6, window_bounds = array<i64: 8, 16>}, {transform_indices = @transform_7, window_bounds = array<i64: 8, 8>}, {transform_indices = @transform_8, window_bounds = array<i64: 8, 8>}]} {
    %c0 = arith.constant 0 : index
    %c0_0 = arith.constant 0 : index
    %c0_1 = arith.constant 0 : index
    %0 = vector.load %arg1[%c0, %c0_0, %c0_1] : memref<8x8x32xf32, #tpu.memory_space<vmem>>, vector<8x8x32xf32>
    %1 = vector.shape_cast %0 : vector<8x8x32xf32> to vector<64x32xf32>
    %c0_2 = arith.constant 0 : index
    %c0_3 = arith.constant 0 : index
    %2 = vector.load %arg3[%c0_2, %c0_3] : memref<32x32xf32, #tpu.memory_space<vmem>>, vector<32x32xf32>
    %cst = arith.constant dense<0.000000e+00> : vector<64x32xf32>
    %3 = tpu.matmul %1, %2, %cst {dimension_numbers = #tpu.dot_dimension_numbers<[1], [0], [0], [1], [0, 0, 1, 1], [], []>} : vector<64x32xf32>, vector<32x32xf32>, vector<64x32xf32> -> vector<64x32xf32>
    %c0_4 = arith.constant 0 : index
    %c0_5 = arith.constant 0 : index
    %4 = vector.load %arg4[%c0_4, %c0_5] : memref<1x32xf32, #tpu.memory_space<vmem>>, vector<1x32xf32>
    %5 = vector.broadcast %4 : vector<1x32xf32> to vector<64x32xf32>
    %6 = arith.addf %3, %5 : vector<64x32xf32>
    %7 = math.tanh %6 : vector<64x32xf32>
    %8 = vector.shape_cast %7 : vector<64x32xf32> to vector<8x8x32xf32>
    %c0_6 = arith.constant 0 : index
    %c0_7 = arith.constant 0 : index
    %9 = vector.load %arg5[%c0_6, %c0_7] : memref<1x32xf32, #tpu.memory_space<vmem>>, vector<1x32xf32>
    %10 = vector.shape_cast %9 : vector<1x32xf32> to vector<1x1x32xf32>
    %11 = vector.broadcast %10 : vector<1x1x32xf32> to vector<8x8x32xf32>
    %12 = arith.mulf %8, %11 : vector<8x8x32xf32>
    %cst_8 = arith.constant dense<0.000000e+00> : vector<8x8xf32>
    %13 = vector.multi_reduction <add>, %12, %cst_8 [2] : vector<8x8x32xf32> to vector<8x8xf32>
    %c0_9 = arith.constant 0 : index
    %14 = memref.load %arg6[%c0_9] : memref<1xf32, #tpu.memory_space<smem>>
    %15 = vector.broadcast %14 : f32 to vector<8x8xf32>
    %16 = arith.addf %13, %15 : vector<8x8xf32>
    %cst_10 = arith.constant dense<0xFF800000> : vector<8xf32>
    %17 = vector.multi_reduction <maximumf>, %16, %cst_10 [1] : vector<8x8xf32> to vector<8xf32>
    %18 = vector.shape_cast %17 : vector<8xf32> to vector<8x1xf32>
    %19 = vector.broadcast %18 : vector<8x1xf32> to vector<8x8xf32>
    %20 = arith.subf %16, %19 : vector<8x8xf32>
    %21 = math.exp %20 : vector<8x8xf32>
    %cst_11 = arith.constant dense<0.000000e+00> : vector<8xf32>
    %22 = vector.multi_reduction <add>, %21, %cst_11 [1] : vector<8x8xf32> to vector<8xf32>
    %23 = vector.shape_cast %22 : vector<8xf32> to vector<8x1xf32>
    %24 = vector.broadcast %23 : vector<8x1xf32> to vector<8x8xf32>
    %25 = arith.divf %21, %24 : vector<8x8xf32>
    %c0_12 = arith.constant 0 : index
    %c0_13 = arith.constant 0 : index
    %c0_14 = arith.constant 0 : index
    %26 = vector.load %arg2[%c0_12, %c0_13, %c0_14] : memref<8x8x16xf32, #tpu.memory_space<vmem>>, vector<8x8x16xf32>
    %27 = vector.shape_cast %25 : vector<8x8xf32> to vector<8x8x1xf32>
    %28 = vector.broadcast %27 : vector<8x8x1xf32> to vector<8x8x16xf32>
    %29 = arith.mulf %28, %26 : vector<8x8x16xf32>
    %cst_15 = arith.constant dense<0.000000e+00> : vector<8x16xf32>
    %30 = vector.multi_reduction <add>, %29, %cst_15 [1] : vector<8x8x16xf32> to vector<8x16xf32>
    %c0_16 = arith.constant 0 : index
    %c0_17 = arith.constant 0 : index
    %31 = vector.load %arg7[%c0_16, %c0_17] : memref<8x16xf32, #tpu.memory_space<vmem>>, vector<8x16xf32>
    tpu.vector_store %arg7[%c0_16, %c0_17], %30 {strides = array<i32>} : memref<8x16xf32, #tpu.memory_space<vmem>>, vector<8x16xf32>,
    %c0_18 = arith.constant 0 : index
    %c0_19 = arith.constant 0 : index
    %32 = vector.load %arg8[%c0_18, %c0_19] : memref<8x8xf32, #tpu.memory_space<vmem>>, vector<8x8xf32>
    tpu.vector_store %arg8[%c0_18, %c0_19], %25 {strides = array<i32>} : memref<8x8xf32, #tpu.memory_space<vmem>>, vector<8x8xf32>,
    %c0_20 = arith.constant 0 : index
    %c0_21 = arith.constant 0 : index
    %33 = vector.load %arg9[%c0_20, %c0_21] : memref<8x8xf32, #tpu.memory_space<vmem>>, vector<8x8xf32>
    tpu.vector_store %arg9[%c0_20, %c0_21], %16 {strides = array<i32>} : memref<8x8xf32, #tpu.memory_space<vmem>>, vector<8x8xf32>,
    return
  }
  func.func @transform_0(%arg0: i32) -> (i32, i32, i32) {
    %c0_i32 = arith.constant 0 : i32
    %c0_i32_0 = arith.constant 0 : i32
    %c0_i32_1 = arith.constant 0 : i32
    return %arg0, %c0_i32, %c0_i32_0 : i32, i32, i32
  }
  func.func @transform_1(%arg0: i32) -> (i32, i32, i32) {
    %c0_i32 = arith.constant 0 : i32
    %c0_i32_0 = arith.constant 0 : i32
    %c0_i32_1 = arith.constant 0 : i32
    return %arg0, %c0_i32, %c0_i32_0 : i32, i32, i32
  }
  func.func @transform_2(%arg0: i32) -> (i32, i32) {
    %c0_i32 = arith.constant 0 : i32
    %c0_i32_0 = arith.constant 0 : i32
    %c0_i32_1 = arith.constant 0 : i32
    return %c0_i32, %c0_i32_0 : i32, i32
  }
  func.func @transform_3(%arg0: i32) -> (i32, i32) {
    %c0_i32 = arith.constant 0 : i32
    %c0_i32_0 = arith.constant 0 : i32
    %c0_i32_1 = arith.constant 0 : i32
    return %c0_i32, %c0_i32_0 : i32, i32
  }
  func.func @transform_4(%arg0: i32) -> (i32, i32) {
    %c0_i32 = arith.constant 0 : i32
    %c0_i32_0 = arith.constant 0 : i32
    %c0_i32_1 = arith.constant 0 : i32
    return %c0_i32, %c0_i32_0 : i32, i32
  }
  func.func @transform_5(%arg0: i32) -> i32 {
    %c0_i32 = arith.constant 0 : i32
    %c0_i32_0 = arith.constant 0 : i32
    return %c0_i32 : i32
  }
  func.func @transform_6(%arg0: i32) -> (i32, i32) {
    %c0_i32 = arith.constant 0 : i32
    %c0_i32_0 = arith.constant 0 : i32
    return %arg0, %c0_i32 : i32, i32
  }
  func.func @transform_7(%arg0: i32) -> (i32, i32) {
    %c0_i32 = arith.constant 0 : i32
    %c0_i32_0 = arith.constant 0 : i32
    return %arg0, %c0_i32 : i32, i32
  }
  func.func @transform_8(%arg0: i32) -> (i32, i32) {
    %c0_i32 = arith.constant 0 : i32
    %c0_i32_0 = arith.constant 0 : i32
    return %arg0, %c0_i32 : i32, i32
  }
}

</mosaic_0001>

<bundles_post_ra>
// kernel: tpu_custom_call.1
= control target key start
LH: loop header
LB: loop body
LE: loop exit
PB: predicated region body
PF: predicated region fallthrough
CT: control target
= control target key end

     0   :  { %s1951_s0 = inlined_call_operand.hbm [shape: f32[16,8,32], index: 0, kind: input, shape index: {}]   ;;  %s1952_s1 = inlined_call_operand.hbm [shape: f32[16,8,16], index: 1, kind: input, shape index: {}]   ;;  %s1953_s2 = inlined_call_operand.hbm [shape: f32[32,32], index: 2, kind: input, shape index: {}]   ;;  %s1954_s3 = inlined_call_operand.vmem [shape: f32[1,32], index: 3, kind: input, shape index: {}]   ;;  %s1955_s4 = inlined_call_operand.vmem [shape: f32[1,32], index: 4, kind: input, shape index: {}]   ;;  %s1956_s5 = inlined_call_operand.<no memory space> [shape: f32[1], index: 5, kind: input, shape index: {}]   ;;  %s1957_s6 = inlined_call_operand.hbm [shape: f32[16,16], index: 6, kind: output, shape index: {0}]   ;;  %s1958_s7 = inlined_call_operand.vmem [shape: f32[16,8], index: 7, kind: output, shape index: {1}]   ;;  %s1959_s8 = inlined_call_operand.vmem [shape: f32[16,8], index: 8, kind: output, shape index: {2}]  }
   0x1   :  { %1969 = sst [smem:[#allocation17_spill]] %s1951_s0 }
   0x2   :  { %1970 = sst [smem:[#allocation18_spill]] %s1953_s2 }
   0x3   :  { %14 = sst [smem:[#allocation2]] %s1956_s5 }
   0x4   :  { %15 = vsyncpa [#allocation4], 0 }
   0x5   :  { %17 = vsyncpa [#allocation4 + $0x1], 0 }
   0x6   :  { %18 = vsyncpa [#allocation7], 0 }
   0x7   :  { %20 = vsyncpa [#allocation7 + $0x1], 0 }
   0x8   :  { %21 = vsyncpa [#allocation5], 0 }
   0x9   :  { %23 = vsyncpa [#allocation5 + $0x1], 0  ;;  %s1517_s29 = smov 0   ;;  %s1519_s30 = smov 0  }
   0xa   :  { %s1521_s9 = smov 0   ;;  %s1523_s10 = smov 0  }
   0xb LB: > { %1971 = sst [smem:[#allocation14_spill]] %s1459_s9  ;;  %s1538_s5 = sadd.s32 4294967295, %s1463_s10   ;;  %s1463_s10 = sphi %s1523_s10, %s1991_s10   ;;  %s1459_s9 = sphi %s1521_s9, %s1993_s9   ;;  %s1455_s30 = sphi %s1519_s30, %s1995_s30   ;;  %s1451_s29 = sphi %s1517_s29, %s1994_s29  }
   0xc   : > { %s1138_s11 = sadd.s32 4294967294, %s1463_s10   ;;  %p49_p0 = scmp.ne.s32.totalorder %s1455_s30, %s1451_s29 }
   0xd   : > { %p50_p1 = scmp.eq.s32.totalorder %s1538_s5, 0  ;;  %p183_p2 = scmp.eq.s32.totalorder %s1538_s5, 1 }
   0xe   : > { %p189_p3 = scmp.eq.s32.totalorder %s1138_s11, 1  ;;  %p1139_p5 = scmp.ge.s32.totalorder %s1463_s10, 1 }
   0xf   : > { %p1547_p4 = por %p50_p1, %p49_p0  ;;  %p248_p7 = scmp.lt.s32.totalorder %s1463_s10, 3 }
  0x10   : > { %p1552_p6 = por %p189_p3, %p49_p0  ;;  %s1974_s2 = sld [smem:[#allocation18_spill]] }
  0x11   : > { %p1560_p8 = pnand %p1139_p5, %p248_p7  ;;  %s1465_s18 = smov [#allocation8]  }
  0x12   : > { %s261_s19 = sshll.u32 %s1465_s18, 4  ;;  %s1570_s20 = sadd.s32 1, %s1463_s10   ;;  %s262_s19 = int_to_ptr.vmem [resolvable:$true] %s261_s19 }
  0x13   : > { %p1191_p9 = pneg %p1560_p8  ;;  %1976 = sst [smem:[#allocation15_spill]] %s1570_s20 }
  0x14   : > { %s1960_s21 = smov 128   ;;  %s1962_s22 = smov 8  }
  0x15   : > { %p1192_p10 = pnand %p1191_p9, %p50_p1  ;;  %s33_s23 = ssub.s32 %s1463_s10, %s1570_s20 }
  0x16   : > { %s259_s16 = sshll.u32 %s1974_s2, 4  ;;  %s36_s24 = sadd.s32 1, %s1459_s9  ;;  %s260_s16 = int_to_ptr.hbm [resolvable:$true] %s259_s16 }
  0x17   : > { %1194 = dma.hbm_to_vmem [thread:$0]  (!%p1192_p10), %s260_s16, 512, %s262_s19, [#allocation7], %s1960_s21, %s1960_s21, %s1962_s22  }
  0x18   : > { %p34_p12 = scmp.eq.s32.totalorder %s33_s23, 0  ;;  %p43_p13 = scmp.ne.s32.totalorder %s1459_s9, %s1455_s30 }
  0x19   : > { %p44_p0 = scmp.eq.s32.totalorder %s1463_s10, 0  ;;  %p1207_p3 = scmp.lt.s32.totalorder %s1463_s10, 2 }
  0x1a   : > { %s1583_s25 = scalar_select %p34_p12, %s1459_s9, %s36_s24  }
  0x1b   : > { %p45_p5 = por %p44_p0, %p43_p13  ;;  %p1587_p7 = por %p183_p2, %p43_p13 }
  0x1c   : > { %1977 = sst [smem:[#allocation16_spill]] %s1583_s25  ;;  %s284_s27 = sand.u32 1, %s1459_s9  }
  0x1d   : > { %s1167_s28 = sshll.u32 %s1463_s10, 6  ;;  %s1142_s11 = sshll.u32 %s284_s27, 6 }
  0x1e   : > { %s1979_s0 = sld [smem:[#allocation17_spill]]  ;;  %s288_s19 = scalar_lea.vmem [#allocation3], %s1142_s11 }
  0x1f   : > { %s296_s23 = sshll.u32 %s288_s19, 4  ;;  %p1598_p9 = pnand %p1207_p3, %p45_p5  ;;  %s297_s23 = int_to_ptr.vmem [resolvable:$true] %s296_s23 }
  0x20   : > { %s315_s2 = scalar_lea.hbm %s1952_s1, %s1167_s28  ;;  %s310_s25 = scalar_lea.vmem [#allocation6], %s1142_s11 }
  0x21   : > { %s1605_s9 = sshll.u32 %s310_s25, 4  ;;  %s316_s14 = sshll.u32 %s315_s2, 4  ;;  %s317_s14 = int_to_ptr.hbm [resolvable:$true] %s316_s14  ;;  %s319_s9 = int_to_ptr.vmem [resolvable:$true] %s1605_s9 }
  0x22   : > { %s285_s15 = scalar_lea.sflag [#allocation4], %s284_s27  ;;  %p1333_p10 = pneg %p1598_p9 }
  0x24   : > { %s293_s16 = scalar_lea.hbm %s1979_s0, %s1167_s28  ;;  %s1336_s22 = scalar_lea.hbm %s1979_s0, 128 }
  0x25   : > { %s294_s18 = sshll.u32 %s293_s16, 4  ;;  %s295_s18 = int_to_ptr.hbm [resolvable:$true] %s294_s18 }
  0x26   : > { %s1329_s16 = sshra.s32 %s295_s18, 4  ;;  %s1330_s16 = int_to_ptr.hbm [resolvable:$true] %s1329_s16 }
  0x27   : > { %s1331_s19 = scalar_lea.hbm %s1330_s16, 64  ;;  %p1337_p0 = scmp.lt.s32.totalorder %s1330_s16, %s1979_s0 }
  0x28   : > { %p1332_p2 = scmp.ne.s32.totalorder %s1330_s16, %s1331_s19  ;;  %p1338_p3 = scmp.lt.s32.totalorder %s1336_s22, %s1331_s19 }
  0x2a   : > { %p1334_p12 = pnand %p1333_p10, %p1332_p2  ;;  %p1339_p5 = por %p1338_p3, %p1337_p0 }
  0x2c   : > { %p1335_p13 = pneg %p1334_p12 }
  0x2e   : > { %p1340_p11 = pnand %p1339_p5, %p1335_p13 }
  0x30   : > { %1343 = shalt.err (!%p1340_p11)
}
  0x31   : > { %s1981_s2 = smov 8   ;;  %s1982_s25 = smov 128  }
  0x32   : > { %1198 = dma.hbm_to_vmem [thread:$0]  (!%p1598_p9), %s295_s18, 1024, %s297_s23, %s285_s15, %s1982_s25, %s1982_s25, %s1981_s2  }
  0x33   : > { %s306_s20 = sand.u32 1, %s1463_s10   ;;  %s1359_s21 = sshra.s32 %s317_s14, 4  ;;  %s1360_s21 = int_to_ptr.hbm [resolvable:$true] %s1359_s21 }
  0x34   : > { %s307_s27 = scalar_lea.sflag [#allocation7], %s306_s20  ;;  %s1361_s16 = scalar_lea.hbm %s1360_s21, 64 }
  0x35   : > { %p1362_p2 = scmp.ne.s32.totalorder %s1360_s21, %s1361_s16  ;;  %s1366_s28 = scalar_lea.hbm %s1952_s1, 128 }
  0x36   : > { %p1367_p13 = scmp.lt.s32.totalorder %s1360_s21, %s1952_s1  ;;  %p1368_p0 = scmp.lt.s32.totalorder %s1366_s28, %s1361_s16 }
  0x37   : > { %p1364_p11 = pnand %p1362_p2, %p1333_p10 }
  0x38   : > { %p1369_p3 = por %p1368_p0, %p1367_p13 }
  0x39   : > { %p1365_p12 = pneg %p1364_p11 }
  0x3b   : > { %p1370_p5 = pnand %p1369_p3, %p1365_p12 }
  0x3d   : > { %1373 = shalt.err (!%p1370_p5)
}
  0x3e   : > { %1201 = dma.hbm_to_vmem [thread:$0]  (!%p1598_p9), %s317_s14, 1024, %s319_s9, %s307_s27, %s1982_s25, %s1982_s25, %s1981_s2  }
  0x3f   : > { %330 = sbr.rel (%p1560_p8) target bundleno = 922 (0x39a), region = 44  ;;  %s1642_s18 = sand.u32 (!%p1560_p8), 1, %s1455_s30  }
  0x40   : > { %s1149_s0 = sshll.u32 (!%p1560_p8), %s1642_s18, 6  ;;  %s333_s23 = scalar_lea.sflag (!%p1560_p8), [#allocation4], %s1642_s18 }
  0x41   : > { %s1646_s15 = scalar_lea.vmem (!%p1560_p8), [#allocation3], %s1149_s0 }
  0x44   : > { %1434 = dma.done.wait (%p1547_p4), %s333_s23, 1024  }
  0x45   : > { %1436 = vsyncadd (%p1547_p4), %s333_s23, 4294966272  ;;  %s342_s9 = sand.u32 1, %s1538_s5   ;;  %s1653_s24 = scalar_lea.vmem [#allocation6], %s1149_s0 }
  0x46   : > { %s343_s17 = scalar_lea.sflag [#allocation7], %s342_s9 }
  0x47   : > { %1438 = dma.done.wait (%p1547_p4), %s343_s17, 1024  }
  0x48   : > { %1440 = vsyncadd (%p1547_p4), %s343_s17, 4294966272 }
  0x49   : > { %1442 = dma.done.wait (%p50_p1), [#allocation7], 512  }
  0x4a   : > { %1444 = vsyncadd (%p50_p1), [#allocation7], 4294966784  ;;  %v419_v0 = vld [vmem:[#allocation8 + $0x18] sm:$0xff]  ;;  %v418_v1 = vld [vmem:[#allocation8 + $0x10] sm:$0xff]  ;;  %vm424_vm0 = vcmask 261120   ;;  %s534_s20 = sld [smem:[#allocation2]]  ;;  %v552_v56 = vlaneseq }
  0x4b   : > { %461 = vmatpush.msra.mxu0 %v419_v0  ;;  %1170 = vmatpush.msra.mxu2 %v419_v0  ;;  %v417_v2 = vld [vmem:[#allocation8 + $0x8] sm:$0xff]  ;;  %v416_v3 = vld [vmem:[#allocation8] sm:$0xff]  ;;  %v410_v6 = vld [vmem:[%s1646_s15 + $0x10] sm:$0xff]  ;;  %p400_p1 = scmp.lt.s32.totalorder %s1538_s5, 1  ;;  %vm562_vm1 = vcmask 1041409   ;;  %vm564_vm2 = vcmask 1042434  }
  0x4c   : > { %1169 = vmatpush.msra.mxu1 %v419_v0  ;;  %1171 = vmatpush.msra.mxu3 %v419_v0  ;;  %v408_v4 = vld [vmem:[%s1646_s15] sm:$0xff]  ;;  %v414_v7 = vld [vmem:[%s1646_s15 + $0x30] sm:$0xff]  ;;  %v409_v8 = vld [vmem:[%s1646_s15 + $0x8] sm:$0xff]  ;;  %v1693_v58 = vand.u32 127, %v552_v56  ;;  %vm566_vm3 = vcmask 1043459   ;;  %vm568_vm4 = vcmask 1044484  }
  0x4d   : > { %462 = vmatpush.msra.mxu0 %v418_v1  ;;  %1173 = vmatpush.msra.mxu2 %v418_v1  ;;  %v412_v5 = vld [vmem:[%s1646_s15 + $0x20] sm:$0xff]  ;;  %v413_v9 = vld [vmem:[%s1646_s15 + $0x28] sm:$0xff]  ;;  %v411_v10 = vld [vmem:[%s1646_s15 + $0x18] sm:$0xff]  ;;  %s1702_s27 = scalar_select %p400_p1, %s1538_s5, 1  ;;  %vm570_vm5 = vcmask 1045509   ;;  %vm572_vm6 = vcmask 1046534  }
  0x4e   : > { %1172 = vmatpush.msra.mxu1 %v418_v1  ;;  %1174 = vmatpush.msra.mxu3 %v418_v1  ;;  %v415_v11 = vld [vmem:[%s1646_s15 + $0x38] sm:$0xff]  ;;  %v1249_v12 = vld [vmem:[%s1954_s3] ss:$0 sm:$0xff]  ;;  %vm1968_vm7 = vcmask 1047559   ;;  %vm1967_vm8 = vcmask 64512   ;;  %s1152_s23 = sshll.u32 %s1642_s18, 3 }
  0x4f   : > { %463 = vmatpush.msra.mxu0 %v417_v2  ;;  %1176 = vmatpush.msra.mxu2 %v417_v2  ;;  %v1250_v17 = vld [vmem:[%s1955_s4] ss:$0 sm:$0xff]  ;;  %s1153_s21 = sshll.u32 %s1702_s27, 3  ;;  %s1164_s15 = sshll.u32 %s1538_s5, 3 }
  0x50   : > { %1175 = vmatpush.msra.mxu1 %v417_v2  ;;  %1177 = vmatpush.msra.mxu3 %v417_v2  ;;  %v535_v57 = vstv %s534_s20  ;;  %s407_s22 = scalar_lea.vmem %s1959_s8, %s1153_s21  ;;  %s403_s0 = scalar_lea.vmem %s1958_s7, %s1153_s21 }
  0x51   : > { %464 = vmatpush.msra.mxu0 %v416_v3  ;;  %1179 = vmatpush.msra.mxu2 %v416_v3  ;;  %s385_s5 = scalar_lea.vmem [#allocation9], %s1152_s23  ;;  %s959_s2 = scalar_lea.sflag [#allocation5], %s1642_s18 }
  0x52   : > { %1178 = vmatpush.msra.mxu1 %v416_v3  ;;  %1155 = vmatmul.msk.f32.vlgmr.msra.gmra.mxu0 %vm424_vm0, %v408_v4  ;;  %s979_s12 = sshll.u32 %s385_s5, 4  ;;  %s1409_s16 = scalar_lea.hbm %s1957_s6, 16  ;;  %s980_s12 = int_to_ptr.vmem [resolvable:$true] %s979_s12 }
  0x53   : > { %1159 = vmatmul.msk.f32.vlgmr.msra.gmra.mxu2 %vm424_vm0, %v412_v5  ;;  %1157 = vmatmul.msk.f32.vlgmr.msra.gmra.mxu1 %vm424_vm0, %v410_v6 }
  0x54   : > { %1180 = vmatpush.msra.mxu3 %v416_v3 }
  0x55   : > { %1161 = vmatmul.msk.f32.vlgmr.msra.gmra.mxu3 %vm424_vm0, %v414_v7 }
  0x5a   : > { %1156 = vmatmul.msk.f32.gmra.mxu0 %vm424_vm0, %v409_v8 }
  0x5b   : > { %1160 = vmatmul.msk.f32.gmra.mxu2 %vm424_vm0, %v413_v9  ;;  %1158 = vmatmul.msk.f32.gmra.mxu1 %vm424_vm0, %v411_v10 }
  0x5d   : > { %1162 = vmatmul.msk.f32.gmra.mxu3 %vm424_vm0, %v415_v11 }
  0xcf   : > { %v466_v13 = vpop.f32.mrf.mxu0 }
  0xd0   : > { %v467_v14 = vadd.f32 %v1249_v12, %v466_v13  ;;  %v472_v15 = vpop.f32.mrf.mxu1 }
  0xd1   : > { %v473_v16 = vadd.f32 %v1249_v12, %v472_v15 }
  0xd2   : > { %1251 = vtanh.f32 %v467_v14 }
  0xd3   : > { %1253 = vtanh.f32 %v473_v16 }
  0xd6   : > { %v478_v18 = vpop.f32.mrf.mxu2 }
  0xd7   : > { %v479_v19 = vadd.f32 %v1249_v12, %v478_v18  ;;  %v469_v20 = vpop.f32.mrf.mxu0 }
  0xd8   : > { %v1252_v21 = vpop.eup %1251  ;;  %v470_v22 = vadd.f32 %v1249_v12, %v469_v20  ;;  %v475_v23 = vpop.f32.mrf.mxu1 }
  0xd9   : > { %v484_v24 = vpop.f32.mrf.mxu3  ;;  %v1254_v25 = vpop.eup %1253  ;;  %1255 = vtanh.f32 %v479_v19  ;;  %v476_v26 = vadd.f32 %v1249_v12, %v475_v23  ;;  %v502_v27 = vmul.f32 %v1252_v21, %v1250_v17 }
  0xda   : > { %1257 = vtanh.f32 %v470_v22  ;;  %v485_v28 = vadd.f32 %v1249_v12, %v484_v24  ;;  %v504_v29 = vmul.f32 %v1254_v25, %v1250_v17  ;;  %v1468_v25 = vmov 0  }
  0xdb   : > { %1259 = vtanh.f32 %v476_v26  ;;  %v510_v30 = vsel %vm424_vm0, %v502_v27, 0.0  ;;  %1248 = vset.pattern.permute.xlu2 %v1468_v25  ;;  %1247 = vset.pattern.permute.xlu1 %v1468_v25 }
  0xdc   : > { %511 = vadd.xlane.f32.xlu0 %v510_v30  ;;  %v516_v31 = vsel %vm424_vm0, %v504_v29, 0.0  ;;  %1261 = vtanh.f32 %v485_v28 }
  0xdd   : > { %517 = vadd.xlane.f32.xlu1 %v516_v31  ;;  %1246 = vset.pattern.permute.xlu0 %v1468_v25 }
  0xde   : > { %v481_v32 = vpop.f32.mrf.mxu2 }
  0xdf   : > { %v1256_v33 = vpop.eup %1255  ;;  %v482_v34 = vadd.f32 %v1249_v12, %v481_v32 }
  0xe0   : > { %v1258_v35 = vpop.eup %1257  ;;  %v506_v37 = vmul.f32 %v1256_v33, %v1250_v17 }
  0xe1   : > { %v487_v36 = vpop.f32.mrf.mxu3  ;;  %v1260_v38 = vpop.eup %1259  ;;  %1263 = vtanh.f32 %v482_v34  ;;  %v503_v40 = vmul.f32 %v1258_v35, %v1250_v17 }
  0xe2   : > { %v488_v39 = vadd.f32 %v1249_v12, %v487_v36  ;;  %v522_v41 = vsel %vm424_vm0, %v506_v37, 0.0  ;;  %v505_v42 = vmul.f32 %v1260_v38, %v1250_v17  ;;  %v1262_v44 = vpop.eup %1261 }
  0xe3   : > { %523 = vadd.xlane.f32.xlu2 %v522_v41  ;;  %v513_v43 = vsel %vm424_vm0, %v503_v40, 0.0  ;;  %v508_v47 = vmul.f32 %v1262_v44, %v1250_v17 }
  0xe4   : > { %1265 = vtanh.f32 %v488_v39  ;;  %514 = vadd.xlane.f32.xlu0 %v513_v43  ;;  %v519_v45 = vsel %vm424_vm0, %v505_v42, 0.0 }
  0xe5   : > { %520 = vadd.xlane.f32.xlu1 %v519_v45  ;;  %v528_v52 = vsel %vm424_vm0, %v508_v47, 0.0 }
  0xe7   : > { %v1264_v46 = vpop.eup %1263 }
  0xe8   : > { %v507_v48 = vmul.f32 %v1264_v46, %v1250_v17 }
  0xea   : > { %v1266_v49 = vpop.eup %1265  ;;  %v525_v50 = vsel %vm424_vm0, %v507_v48, 0.0 }
  0xeb   : > { %v509_v51 = vmul.f32 %v1266_v49, %v1250_v17  ;;  %526 = vadd.xlane.f32.xlu2 %v525_v50 }
  0xec   : > { %529 = vadd.xlane.f32.xlu0 %v528_v52 }
  0xed   : > { %v531_v53 = vsel %vm424_vm0, %v509_v51, 0.0 }
  0xee   : > { %532 = vadd.xlane.f32.xlu1 %v531_v53 }
 0x14f   : > { %v512_v54 = vpop.xlane.xlu0 %511 }
 0x150   : > { %v518_v55 = vpop.xlane.xlu1 %517  ;;  %v536_v59 = vadd.f32 %v535_v57, %v512_v54 }
 0x151   : > { %v538_v61 = vadd.f32 %v535_v57, %v518_v55 }
 0x152   : > { %v554_v2 = vperm.slane %v536_v59, %v1693_v58 }
 0x153   : > { %v556_v4 = vperm.slane %v538_v61, %v1693_v58 }
 0x156   : > { %v524_v60 = vpop.xlane.xlu2 %523 }
 0x157   : > { %v515_v62 = vpop.xlane.xlu0 %514  ;;  %v540_v6 = vadd.f32 %v535_v57, %v524_v60 }
 0x158   : > { %v537_v63 = vadd.f32 %v535_v57, %v515_v62  ;;  %v521_v0 = vpop.xlane.xlu1 %520 }
 0x159   : > { %v539_v1 = vadd.f32 %v535_v57, %v521_v0  ;;  %v558_v13 = vperm.slane %v540_v6, %v1693_v58 }
 0x15a   : > { %v555_v3 = vperm.slane %v537_v63, %v1693_v58 }
 0x15b   : > { %v557_v5 = vperm.slane %v539_v1, %v1693_v58 }
 0x15c   : > { %v563_v7 = vsel %vm562_vm1, %v555_v3, %v554_v2 }
 0x15d   : > { %v565_v8 = vsel %vm564_vm2, %v556_v4, %v563_v7 }
 0x15e   : > { %v527_v9 = vpop.xlane.xlu2 %526  ;;  %v567_v10 = vsel %vm566_vm3, %v557_v5, %v565_v8 }
 0x15f   : > { %v541_v11 = vadd.f32 %v535_v57, %v527_v9  ;;  %v530_v12 = vpop.xlane.xlu0 %529  ;;  %v569_v19 = vsel %vm568_vm4, %v558_v13, %v567_v10 }
 0x160   : > { %v542_v14 = vadd.f32 %v535_v57, %v530_v12 }
 0x161   : > { %v533_v15 = vpop.xlane.xlu1 %532  ;;  %v559_v16 = vperm.slane %v541_v11, %v1693_v58 }
 0x162   : > { %v543_v17 = vadd.f32 %v535_v57, %v533_v15  ;;  %v560_v18 = vperm.slane %v542_v14, %v1693_v58 }
 0x163   : > { %v571_v21 = vsel %vm570_vm5, %v559_v16, %v569_v19 }
 0x164   : > { %v561_v20 = vperm.slane %v543_v17, %v1693_v58  ;;  %v573_v22 = vsel %vm572_vm6, %v560_v18, %v571_v21 }
 0x166   : > { %v575_v23 = vsel %vm1968_vm7, %v561_v20, %v573_v22 }
 0x167   : > { %v578_v24 = vsel %vm1967_vm8, %v575_v23, -inf  ;;  %957 = vst.msk [vmem:[%s407_s22] sm:$0xff] %vm1967_vm8, %v575_v23 }
 0x168   : > { %579 = vmax.xlane.f32.xlu2 %v578_v24 }
 0x1db   : > { %v580_v26 = vpop.xlane.xlu2 %579 }
 0x1dc   : > { %v584_v27 = vperm.slane %v580_v26, 2  ;;  %v583_v28 = vperm.slane %v580_v26, 1  ;;  %v582_v29 = vperm.slane %v580_v26, 0  ;;  %v585_v33 = vperm.slane %v580_v26, 3 }
 0x1dd   : > { %v586_v34 = vperm.slane %v580_v26, 4  ;;  %v589_v35 = vperm.slane %v580_v26, 7  ;;  %v587_v43 = vperm.slane %v580_v26, 5  ;;  %v588_v45 = vperm.slane %v580_v26, 6 }
 0x1de   : > { %v600_v30 = vsub.f32 %v538_v61, %v584_v27  ;;  %v599_v31 = vsub.f32 %v537_v63, %v583_v28  ;;  %v598_v32 = vsub.f32 %v536_v59, %v582_v29  ;;  %v601_v39 = vsub.f32 %v539_v1, %v585_v33 }
 0x1df   : > { %v602_v40 = vsub.f32 %v540_v6, %v586_v34  ;;  %v605_v41 = vsub.f32 %v543_v17, %v589_v35  ;;  %v603_v50 = vsub.f32 %v541_v11, %v587_v43  ;;  %v604_v51 = vsub.f32 %v542_v14, %v588_v45 }
 0x1e0   : > { %v610_v36 = vmul.f32 1.442695, %v600_v30  ;;  %v608_v37 = vmul.f32 1.442695, %v599_v31  ;;  %v606_v38 = vmul.f32 1.442695, %v598_v32 }
 0x1e1   : > { %v612_v42 = vmul.f32 1.442695, %v601_v39  ;;  %v614_v44 = vmul.f32 1.442695, %v602_v40  ;;  %v620_v47 = vmul.f32 1.442695, %v605_v41 }
 0x1e2   : > { %1267 = vpow2.f32 %v610_v36  ;;  %v616_v52 = vmul.f32 1.442695, %v603_v50  ;;  %v618_v53 = vmul.f32 1.442695, %v604_v51 }
 0x1e3   : > { %1269 = vpow2.f32 %v608_v37 }
 0x1e4   : > { %1271 = vpow2.f32 %v606_v38 }
 0x1e5   : > { %1273 = vpow2.f32 %v612_v42 }
 0x1e6   : > { %1275 = vpow2.f32 %v614_v44 }
 0x1e7   : > { %1277 = vpow2.f32 %v620_v47 }
 0x1e8   : > { %v1722_v46 = vpop.eup %1267  ;;  %1279 = vpow2.f32 %v616_v52 }
 0x1e9   : > { %v1724_v48 = vpop.eup %1269  ;;  %637 = vperm.xlu2 %1248, %v1722_v46   ;;  %1281 = vpow2.f32 %v618_v53 }
 0x1ea   : > { %v1727_v49 = vpop.eup %1271  ;;  %634 = vperm.xlu1 %1247, %v1724_v48  }
 0x1eb   : > { %631 = vperm.xlu0 %1246, %v1727_v49   ;;  %v1731_v54 = vpop.eup %1273 }
 0x1ec   : > { %v1733_v55 = vpop.eup %1275 }
 0x1ed   : > { %v1736_v56 = vpop.eup %1277 }
 0x1ee   : > { %v1740_v57 = vpop.eup %1279 }
 0x1ef   : > { %v1742_v59 = vpop.eup %1281 }
 0x1f1   : > { %640 = vperm.xlu2 %1248, %v1731_v54  }
 0x1f2   : > { %643 = vperm.xlu1 %1247, %v1733_v55  }
 0x1f3   : > { %652 = vperm.xlu0 %1246, %v1736_v56  }
 0x1f9   : > { %646 = vperm.xlu2 %1248, %v1740_v57  }
 0x1fa   : > { %649 = vperm.xlu1 %1247, %v1742_v59  }
 0x243   : > { %v638_v60 = vpop.permute.xlu2 %637 }
 0x244   : > { %v656_v4 = vperm.slane %v638_v60, %v1693_v58 }
 0x24b   : > { %v641_v63 = vpop.permute.xlu2 %640 }
 0x24c   : > { %v657_v7 = vperm.slane %v641_v63, %v1693_v58 }
 0x253   : > { %v647_v8 = vpop.permute.xlu2 %646 }
 0x254   : > { %v659_v12 = vperm.slane %v647_v8, %v1693_v58 }
 0x25c   : > { %v635_v61 = vpop.permute.xlu1 %634 }
 0x25d   : > { %v632_v62 = vpop.permute.xlu0 %631  ;;  %v655_v0 = vperm.slane %v635_v61, %v1693_v58 }
 0x25e   : > { %v654_v1 = vperm.slane %v632_v62, %v1693_v58 }
 0x260   : > { %v662_v2 = vsel %vm562_vm1, %v655_v0, %v654_v1 }
 0x261   : > { %v663_v5 = vsel %vm564_vm2, %v656_v4, %v662_v2 }
 0x262   : > { %v664_v9 = vsel %vm566_vm3, %v657_v7, %v663_v5 }
 0x264   : > { %v644_v3 = vpop.permute.xlu1 %643 }
 0x265   : > { %v658_v6 = vperm.slane %v644_v3, %v1693_v58  ;;  %v653_v11 = vpop.permute.xlu0 %652 }
 0x266   : > { %v661_v15 = vperm.slane %v653_v11, %v1693_v58 }
 0x267   : > { %v665_v10 = vsel %vm568_vm4, %v658_v6, %v664_v9 }
 0x268   : > { %v666_v16 = vsel %vm570_vm5, %v659_v12, %v665_v10 }
 0x26c   : > { %v650_v13 = vpop.permute.xlu1 %649 }
 0x26d   : > { %v660_v14 = vperm.slane %v650_v13, %v1693_v58 }
 0x26f   : > { %v667_v17 = vsel %vm572_vm6, %v660_v14, %v666_v16 }
 0x270   : > { %v668_v18 = vsel %vm1968_vm7, %v661_v15, %v667_v17 }
 0x271   : > { %v670_v19 = vsel %vm1967_vm8, %v668_v18, 0.0 }
 0x272   : > { %671 = vadd.xlane.f32.xlu2 %v670_v19 }
 0x2e5   : > { %v672_v20 = vpop.xlane.xlu2 %671 }
 0x2e6   : > { %v674_v21 = vperm.slane %v672_v20, 0  ;;  %v675_v22 = vperm.slane %v672_v20, 1  ;;  %v1762_v23 = vperm.slane %v672_v20, 2  ;;  %v1764_v24 = vperm.slane %v672_v20, 3 }
 0x2e7   : > { %v1766_v25 = vperm.slane %v672_v20, 4  ;;  %v1768_v26 = vperm.slane %v672_v20, 5  ;;  %v1774_v31 = vperm.slane %v672_v20, 7  ;;  %v1776_v34 = vperm.slane %v672_v20, 6 }
 0x2e8   : > { %1283 = vrcp.f32 %v674_v21  ;;  %v714_v27 = vand.u32 2147483647, %v675_v22  ;;  %v716_v28 = vand.u32 2147483648, %v675_v22  ;;  %v699_v29 = vand.u32 2147483647, %v674_v21 }
 0x2e9   : > { %1285 = vrcp.f32 %v675_v22  ;;  %v701_v32 = vand.u32 2147483648, %v674_v21  ;;  %vm710_vm9 = vweird.f32 %v675_v22  ;;  %vm695_vm11 = vweird.f32 %v674_v21 }
 0x2ea   : > { %1287 = vrcp.f32 %v1762_v23  ;;  %vm1780_vm10 = vcmp.eq.f32.partialorder %v714_v27, 8.507059e+37  ;;  %v717_v40 = vor.u32 1.1754944e-38, %v716_v28  ;;  %vm1786_vm12 = vcmp.eq.f32.partialorder %v699_v29, 8.507059e+37 }
 0x2eb   : > { %1289 = vrcp.f32 %v1764_v24  ;;  %v702_v47 = vor.u32 1.1754944e-38, %v701_v32  ;;  %v746_v1 = vand.u32 2147483648, %v1764_v24  ;;  %v731_v3 = vand.u32 2147483648, %v1762_v23 }
 0x2ec   : > { %1291 = vrcp.f32 %v1766_v25  ;;  %v729_v16 = vand.u32 2147483647, %v1762_v23  ;;  %v744_v18 = vand.u32 2147483647, %v1764_v24  ;;  %v776_v28 = vand.u32 2147483648, %v1768_v26 }
 0x2ed   : > { %1293 = vrcp.f32 %v1768_v26  ;;  %v759_v38 = vand.u32 2147483647, %v1766_v25 }
 0x2ee   : > { %v1284_v30 = vpop.eup %1283  ;;  %1295 = vrcp.f32 %v1774_v31 }
 0x2ef   : > { %v1286_v33 = vpop.eup %1285  ;;  %v691_v35 = vmul.f32 %v1284_v30, %v674_v21  ;;  %vm696_vm13 = vweird.f32 %v1284_v30  ;;  %1297 = vrcp.f32 %v1776_v34  ;;  %v732_v21 = vor.u32 1.1754944e-38, %v731_v3  ;;  %v810_v3 = vld [vmem:[%s1653_s24] sm:$0xff] }
 0x2f0   : > { %v1778_v36 = vpop.eup %1287  ;;  %v706_v37 = vmul.f32 %v1286_v33, %v675_v22  ;;  %vm711_vm14 = vweird.f32 %v1286_v33  ;;  %vm697_vm15 = vmor %vm695_vm11, %vm696_vm13  ;;  %vm740_vm11 = vweird.f32 %v1764_v24  ;;  %vm745_vm13 = vcmp.eq.f32.partialorder %v744_v18, 8.507059e+37 }
 0x2f1   : > { %v1784_v39 = vpop.eup %1289  ;;  %v692_v41 = vsub.f32 1.0, %v691_v35  ;;  %v721_v43 = vmul.f32 %v1778_v36, %v1762_v23  ;;  %vm726_vm0 = vweird.f32 %v1778_v36  ;;  %vm712_vm8 = vmor %vm710_vm9, %vm711_vm14  ;;  %vm725_vm9 = vweird.f32 %v1762_v23 }
 0x2f2   : > { %v1792_v44 = vpop.eup %1291  ;;  %v707_v45 = vsub.f32 1.0, %v706_v37  ;;  %v736_v50 = vmul.f32 %v1784_v39, %v1764_v24  ;;  %vm741_vm7 = vweird.f32 %v1784_v39  ;;  %v747_v24 = vor.u32 1.1754944e-38, %v746_v1 }
 0x2f3   : > { %v1797_v51 = vpop.eup %1293  ;;  %v693_v52 = vmul.f32 %v1284_v30, %v692_v41  ;;  %v722_v53 = vsub.f32 1.0, %v721_v43  ;;  %v751_v60 = vmul.f32 %v1792_v44, %v1766_v25  ;;  %v761_v35 = vand.u32 2147483648, %v1766_v25 }
 0x2f4   : > { %v708_v61 = vmul.f32 %v1286_v33, %v707_v45  ;;  %v737_v62 = vsub.f32 1.0, %v736_v50  ;;  %v766_v63 = vmul.f32 %v1797_v51, %v1768_v26  ;;  %v1813_v9 = vpop.eup %1295  ;;  %vm771_vm14 = vweird.f32 %v1797_v51 }
 0x2f5   : > { %v694_v0 = vadd.f32 %v1284_v30, %v693_v52  ;;  %v723_v2 = vmul.f32 %v1778_v36, %v722_v53  ;;  %v752_v8 = vsub.f32 1.0, %v751_v60  ;;  %v1832_v20 = vpop.eup %1297  ;;  %v796_v23 = vmul.f32 %v1813_v9, %v1774_v31 }
 0x2f6   : > { %v709_v4 = vadd.f32 %v1286_v33, %v708_v61  ;;  %v738_v5 = vmul.f32 %v1784_v39, %v737_v62  ;;  %v767_v13 = vsub.f32 1.0, %v766_v63  ;;  %v781_v32 = vmul.f32 %v1832_v20, %v1776_v34 }
 0x2f7   : > { %v698_v6 = vsel %vm697_vm15, %v1284_v30, %v694_v0  ;;  %v724_v7 = vadd.f32 %v1778_v36, %v723_v2  ;;  %vm755_vm15 = vweird.f32 %v1766_v25  ;;  %v774_v41 = vand.u32 2147483647, %v1768_v26 }
 0x2f8   : > { %v713_v10 = vsel %vm712_vm8, %v1286_v33, %v709_v4  ;;  %v703_v11 = vsel %vm1786_vm12, %v702_v47, %v698_v6  ;;  %v739_v12 = vadd.f32 %v1784_v39, %v738_v5  ;;  %vm727_vm8 = vmor %vm725_vm9, %vm726_vm0  ;;  %v768_v22 = vmul.f32 %v1797_v51, %v767_v13  ;;  %v811_v4 = vld [vmem:[%s1653_s24 + $0x8] sm:$0xff]  ;;  %v812_v13 = vld [vmem:[%s1653_s24 + $0x10] sm:$0xff] }
 0x2f9   : > { %v718_v14 = vsel %vm1780_vm10, %v717_v40, %v713_v10  ;;  %v704_v15 = vmul.f32 %v1727_v49, %v703_v11  ;;  %vm742_vm12 = vmor %vm740_vm11, %vm741_vm7  ;;  %v728_v19 = vsel %vm727_vm8, %v1778_v36, %v724_v7  ;;  %v753_v49 = vmul.f32 %v1792_v44, %v752_v8 }
 0x2fa   : > { %v719_v17 = vmul.f32 %v1724_v48, %v718_v14  ;;  %v743_v48 = vsel %vm742_vm12, %v1784_v39, %v739_v12  ;;  %vm730_vm10 = vcmp.eq.f32.partialorder %v729_v16, 8.507059e+37  ;;  %vm756_vm7 = vweird.f32 %v1792_v44 }
 0x2fb   : > { %820 = vperm.xlu1 %1247, %v704_v15   ;;  %v733_v27 = vsel %vm730_vm10, %v732_v21, %v728_v19  ;;  %v748_v29 = vsel %vm745_vm13, %v747_v24, %v743_v48  ;;  %v754_v30 = vadd.f32 %v1792_v44, %v753_v49  ;;  %v769_v33 = vadd.f32 %v1797_v51, %v768_v22  ;;  %vm757_vm9 = vmor %vm755_vm15, %vm756_vm7 }
 0x2fc   : > { %825 = vperm.xlu0 %1246, %v719_v17   ;;  %v797_v36 = vsub.f32 1.0, %v796_v23  ;;  %v734_v37 = vmul.f32 %v1722_v46, %v733_v27  ;;  %v782_v39 = vsub.f32 1.0, %v781_v32  ;;  %v749_v40 = vmul.f32 %v1731_v54, %v748_v29  ;;  %v814_v29 = vld [vmem:[%s1653_s24 + $0x20] sm:$0xff]  ;;  %v815_v32 = vld [vmem:[%s1653_s24 + $0x28] sm:$0xff] }
 0x2fd   : > { %vm770_vm0 = vweird.f32 %v1768_v26  ;;  %v758_v42 = vsel %vm757_vm9, %v1792_v44, %v754_v30  ;;  %v762_v45 = vor.u32 1.1754944e-38, %v761_v35  ;;  %v777_v47 = vor.u32 1.1754944e-38, %v776_v28 }
 0x2fe   : > { %vm772_vm11 = vmor %vm770_vm0, %vm771_vm14  ;;  %v783_v43 = vmul.f32 %v1832_v20, %v782_v39  ;;  %v798_v25 = vmul.f32 %v1813_v9, %v797_v36  ;;  %vm760_vm8 = vcmp.eq.f32.partialorder %v759_v38, 8.507059e+37  ;;  %vm775_vm12 = vcmp.eq.f32.partialorder %v774_v41, 8.507059e+37 }
 0x2ff   : > { %v773_v46 = vsel %vm772_vm11, %v1797_v51, %v769_v33  ;;  %v763_v54 = vsel %vm760_vm8, %v762_v45, %v758_v42  ;;  %vm786_vm10 = vweird.f32 %v1832_v20  ;;  %vm801_vm13 = vweird.f32 %v1813_v9 }
 0x300   : > { %v778_v50 = vsel %vm775_vm12, %v777_v47, %v773_v46  ;;  %v784_v26 = vadd.f32 %v1832_v20, %v783_v43  ;;  %v799_v52 = vadd.f32 %v1813_v9, %v798_v25  ;;  %v791_v44 = vand.u32 2147483648, %v1776_v34 }
 0x301   : > { %v764_v51 = vmul.f32 %v1733_v55, %v763_v54  ;;  %v806_v53 = vand.u32 2147483648, %v1774_v31  ;;  %vm785_vm7 = vweird.f32 %v1776_v34  ;;  %v789_v60 = vand.u32 2147483647, %v1776_v34 }
 0x302   : > { %v779_v61 = vmul.f32 %v1740_v57, %v778_v50  ;;  %vm800_vm14 = vweird.f32 %v1774_v31  ;;  %v804_v62 = vand.u32 2147483647, %v1774_v31  ;;  %vm787_vm15 = vmor %vm785_vm7, %vm786_vm10  ;;  %v792_v0 = vor.u32 1.1754944e-38, %v791_v44 }
 0x303   : > { %830 = vperm.xlu1 %1247, %v734_v37   ;;  %vm802_vm0 = vmor %vm800_vm14, %vm801_vm13  ;;  %v788_v63 = vsel %vm787_vm15, %v1832_v20, %v784_v26  ;;  %v807_v1 = vor.u32 1.1754944e-38, %v806_v53  ;;  %vm790_vm9 = vcmp.eq.f32.partialorder %v789_v60, 8.507059e+37  ;;  %vm866_vm8 = vcmask 130048  }
 0x304   : > { %835 = vperm.xlu0 %1246, %v749_v40   ;;  %v803_v55 = vsel %vm802_vm0, %v1813_v9, %v799_v52  ;;  %vm805_vm11 = vcmp.eq.f32.partialorder %v804_v62, 8.507059e+37  ;;  %v793_v34 = vsel %vm790_vm9, %v792_v0, %v788_v63  ;;  %v816_v63 = vld [vmem:[%s1653_s24 + $0x30] sm:$0xff]  ;;  %vm1987_vm12 = vcmask 1047559  }
 0x305   : > { %v808_v57 = vsel %vm805_vm11, %v807_v1, %v803_v55  ;;  %v794_v2 = vmul.f32 %v1742_v59, %v793_v34  ;;  %v813_v59 = vld [vmem:[%s1653_s24 + $0x18] sm:$0xff]  ;;  %vm1988_vm10 = vcmask 64512  }
 0x306   : > { %v809_v31 = vmul.f32 %v1736_v56, %v808_v57  ;;  %v817_v1 = vld [vmem:[%s1653_s24 + $0x38] sm:$0xff]  ;;  %s977_s24 = scalar_lea.hbm %s1957_s6, %s1164_s15 }
 0x307   : > { %s981_s14 = sshll.u32 %s977_s24, 4  ;;  %s982_s14 = int_to_ptr.hbm [resolvable:$true] %s981_s14 }
 0x308   : > { %s1403_s25 = sshra.s32 %s982_s14, 4  ;;  %s1404_s25 = int_to_ptr.hbm [resolvable:$true] %s1403_s25 }
 0x309   : > { %s1405_s20 = scalar_lea.hbm %s1404_s25, 8  ;;  %p1410_p10 = scmp.lt.s32.totalorder %s1404_s25, %s1957_s6 }
 0x30a   : > { %p1406_p4 = scmp.ne.s32.totalorder %s1404_s25, %s1405_s20  ;;  %p1411_p2 = scmp.lt.s32.totalorder %s1409_s16, %s1405_s20 }
 0x30b   : > { %840 = vperm.xlu1 %1247, %v764_v51  }
 0x30c   : > { %845 = vperm.xlu0 %1246, %v779_v61   ;;  %p1407_p8 = pnand %p1406_p4, %p1587_p7  ;;  %p1412_p11 = por %p1411_p2, %p1410_p10 }
 0x30e   : > { %p1408_p9 = pneg %p1407_p8 }
 0x310   : > { %p1413_p12 = pnand %p1412_p11, %p1408_p9 }
 0x313   : > { %850 = vperm.xlu1 %1247, %v794_v2  }
 0x314   : > { %855 = vperm.xlu0 %1246, %v809_v31  }
 0x36d   : > { %v821_v5 = vpop.permute.xlu1 %820 }
 0x36e   : > { %v826_v6 = vpop.permute.xlu0 %825  ;;  %v858_v7 = vmul.f32 %v821_v5, %v810_v3  ;;  %v940_v23 = vperm.slane %v821_v5, %v1693_v58 }
 0x36f   : > { %v859_v8 = vmul.f32 %v826_v6, %v811_v4  ;;  %v941_v22 = vperm.slane %v826_v6, %v1693_v58 }
 0x370   : > { %v867_v9 = vsel %vm866_vm8, %v858_v7, 0.0 }
 0x371   : > { %v874_v10 = vsel %vm866_vm8, %v859_v8, 0.0  ;;  %v868_v11 = vrot.slane %v867_v9, 4  ;;  %v948_v38 = vsel %vm562_vm1, %v941_v22, %v940_v23 }
 0x372   : > { %v875_v12 = vrot.slane %v874_v10, 4 }
 0x373   : > { %v869_v56 = vadd.f32 %v868_v11, %v867_v9 }
 0x374   : > { %v876_v14 = vadd.f32 %v875_v12, %v874_v10 }
 0x375   : > { %v831_v15 = vpop.permute.xlu1 %830  ;;  %v870_v20 = vrot.slane %v869_v56, 2 }
 0x376   : > { %v836_v16 = vpop.permute.xlu0 %835  ;;  %v860_v17 = vmul.f32 %v831_v15, %v812_v13  ;;  %v877_v49 = vrot.slane %v876_v14, 2  ;;  %v942_v28 = vperm.slane %v831_v15, %v1693_v58 }
 0x377   : > { %v861_v18 = vmul.f32 %v836_v16, %v813_v59  ;;  %v871_v35 = vadd.f32 %v870_v20, %v869_v56  ;;  %v943_v39 = vperm.slane %v836_v16, %v1693_v58 }
 0x378   : > { %v881_v19 = vsel %vm866_vm8, %v860_v17, 0.0  ;;  %v878_v33 = vadd.f32 %v877_v49, %v876_v14  ;;  %v949_v43 = vsel %vm564_vm2, %v942_v28, %v948_v38 }
 0x379   : > { %v888_v48 = vsel %vm866_vm8, %v861_v18, 0.0  ;;  %v882_v21 = vrot.slane %v881_v19, 4  ;;  %v872_v50 = vrot.slane %v871_v35, 1  ;;  %v950_v53 = vsel %vm566_vm3, %v943_v39, %v949_v43 }
 0x37a   : > { %v889_v24 = vrot.slane %v888_v48, 4  ;;  %v879_v54 = vrot.slane %v878_v33, 1 }
 0x37b   : > { %v883_v27 = vadd.f32 %v882_v21, %v881_v19  ;;  %v873_v57 = vadd.f32 %v872_v50, %v871_v35 }
 0x37c   : > { %v890_v30 = vadd.f32 %v889_v24, %v888_v48  ;;  %v880_v34 = vadd.f32 %v879_v54, %v878_v33 }
 0x37d   : > { %v884_v36 = vrot.slane %v883_v27, 2  ;;  %v841_v37 = vpop.permute.xlu1 %840 }
 0x37e   : > { %v846_v40 = vpop.permute.xlu0 %845  ;;  %v862_v41 = vmul.f32 %v841_v37, %v814_v29  ;;  %v891_v42 = vrot.slane %v890_v30, 2  ;;  %v944_v45 = vperm.slane %v841_v37, %v1693_v58 }
 0x37f   : > { %v863_v46 = vmul.f32 %v846_v40, %v815_v32  ;;  %v885_v25 = vadd.f32 %v884_v36, %v883_v27  ;;  %v945_v51 = vperm.slane %v846_v40, %v1693_v58 }
 0x380   : > { %v895_v47 = vsel %vm866_vm8, %v862_v41, 0.0  ;;  %v892_v60 = vadd.f32 %v891_v42, %v890_v30  ;;  %v951_v62 = vsel %vm568_vm4, %v944_v45, %v950_v53 }
 0x381   : > { %v902_v26 = vsel %vm866_vm8, %v863_v46, 0.0  ;;  %v896_v52 = vrot.slane %v895_v47, 4  ;;  %v886_v55 = vrot.slane %v885_v25, 1  ;;  %v952_v5 = vsel %vm570_vm5, %v945_v51, %v951_v62 }
 0x382   : > { %v903_v44 = vrot.slane %v902_v26, 4  ;;  %v893_v8 = vrot.slane %v892_v60, 1 }
 0x383   : > { %v897_v61 = vadd.f32 %v896_v52, %v895_v47  ;;  %v887_v12 = vadd.f32 %v886_v55, %v885_v25 }
 0x384   : > { %v904_v0 = vadd.f32 %v903_v44, %v902_v26  ;;  %v894_v49 = vadd.f32 %v893_v8, %v892_v60 }
 0x385   : > { %v898_v2 = vrot.slane %v897_v61, 2  ;;  %v851_v31 = vpop.permute.xlu1 %850 }
 0x386   : > { %v905_v3 = vrot.slane %v904_v0, 2  ;;  %v856_v4 = vpop.permute.xlu0 %855  ;;  %v864_v6 = vmul.f32 %v851_v31, %v816_v63  ;;  %v946_v7 = vperm.slane %v851_v31, %v1693_v58 }
 0x387   : > { %v899_v9 = vadd.f32 %v898_v2, %v897_v61  ;;  %v865_v10 = vmul.f32 %v856_v4, %v817_v1  ;;  %v947_v11 = vperm.slane %v856_v4, %v1693_v58  ;;  %v931_v58 = vsel %vm562_vm1, %v880_v34, %v873_v57  ;;  %vm1989_vm1 = vmmov %vm1987_vm12 }
 0x388   : > { %v906_v13 = vadd.f32 %v905_v3, %v904_v0  ;;  %v909_v59 = vsel %vm866_vm8, %v864_v6, 0.0  ;;  %v953_v14 = vsel %vm572_vm6, %v946_v7, %v952_v5  ;;  %v932_v21 = vsel %vm564_vm2, %v887_v12, %v931_v58 }
 0x389   : > { %v900_v56 = vrot.slane %v899_v9, 1  ;;  %v916_v15 = vsel %vm866_vm8, %v865_v10, 0.0  ;;  %v910_v16 = vrot.slane %v909_v59, 4  ;;  %v954_v17 = vsel %vm1987_vm12, %v947_v11, %v953_v14 }
 0x38a   : > { %v917_v18 = vrot.slane %v916_v15, 4  ;;  %956 = vst.msk [vmem:[%s403_s0] sm:$0xff] %vm1988_vm10, %v954_v17  ;;  %v907_v20 = vrot.slane %v906_v13, 1  ;;  %v933_v29 = vsel %vm566_vm3, %v894_v49, %v932_v21 }
 0x38b   : > { %v911_v19 = vadd.f32 %v910_v16, %v909_v59  ;;  %v901_v22 = vadd.f32 %v900_v56, %v899_v9 }
 0x38c   : > { %v918_v48 = vadd.f32 %v917_v18, %v916_v15  ;;  %v908_v28 = vadd.f32 %v907_v20, %v906_v13 }
 0x38d   : > { %v912_v23 = vrot.slane %v911_v19, 2  ;;  %v934_v32 = vsel %vm568_vm4, %v901_v22, %v933_v29 }
 0x38e   : > { %v919_v24 = vrot.slane %v918_v48, 2  ;;  %v935_v38 = vsel %vm570_vm5, %v908_v28, %v934_v32 }
 0x38f   : > { %v913_v27 = vadd.f32 %v912_v23, %v911_v19 }
 0x390   : > { %v920_v30 = vadd.f32 %v919_v24, %v918_v48 }
 0x391   : > { %v914_v33 = vrot.slane %v913_v27, 1 }
 0x392   : > { %v921_v35 = vrot.slane %v920_v30, 1 }
 0x393   : > { %v915_v36 = vadd.f32 %v914_v33, %v913_v27 }
 0x394   : > { %v922_v37 = vadd.f32 %v921_v35, %v920_v30 }
 0x395   : > { %v936_v39 = vsel %vm572_vm6, %v915_v36, %v935_v38 }
 0x396   : > { %v937_v40 = vsel %vm1989_vm1, %v922_v37, %v936_v39 }
 0x397   : > { %939 = vst.msk [vmem:[%s385_s5] sm:$0xff] %vm866_vm8, %v937_v40 }
 0x398   : > { %1416 = shalt.err (!%p1413_p12)
}
 0x399   : > { %1189 = dma.vmem_to_hbm [thread:$0]  (%p1587_p7), %s980_s12, 128, %s982_s14, %s959_s2  }
 0x39a PF: > { %s999_s18 = sand.u32 1, %s1451_s29   ;;  %p1990_p13 = scmp.ge.s32.totalorder %s1463_s10, 2 }
 0x39b   : > { %s1000_s28 = scalar_lea.sflag [#allocation5], %s999_s18 }
 0x39c   : > { %p1203_p0 = pnand %p1990_p13, %p1552_p6 }
 0x39e   : > { %p1204_p3 = pneg %p1203_p0 }
 0x3a0   : > { %1446 = dma.done.wait (%p1204_p3), %s1000_s28, 128  }
 0x3a1   : > { %1448 = vsyncadd (%p1204_p3), %s1000_s28, 4294967168  ;;  %s1991_s10 = sld [smem:[#allocation15_spill]]  ;;  %s1994_s29 = smov %s1455_s30 }
 0x3a2   : > { %s1992_s11 = sld [smem:[#allocation14_spill]] }
 0x3a3   : > { %s1993_s9 = sld [smem:[#allocation16_spill]] }
 0x3a7   : > { %p26_p5 = scmp.ge.s32.totalorder %s1991_s10, 4  }
 0x3a8   : > { %s1995_s30 = smov %s1992_s11 }
 0x3a9   :  { %28 = sbr.rel (!%p26_p5) target bundleno = 11 (0xb), region = 130 }
 0x3ae   :  { %1020 = vsyncpa [#allocation4], 1 }
 0x3af   :  { %1022 = vsyncpa [#allocation4 + $0x1], 1 }
 0x3b0   :  { %1023 = vsyncpa [#allocation7], 1 }
 0x3b1   :  { %1025 = vsyncpa [#allocation7 + $0x1], 1 }
 0x3b2   :  { %1026 = vsyncpa [#allocation5], 1 }
 0x3b3   :  { %1028 = vsyncpa [#allocation5 + $0x1], 1 }

</bundles_post_ra>
